<compile_context>
chip_gen: v7x
topology: tpu7x:2x2x1
jax: 0.10.0
libtpu: 0.0.40
codegen_flags: <defaults>
</compile_context>

<pallas_src>
import functools

import jax
import jax.numpy as jnp
from jax.experimental import pallas as pl
from jax.experimental.pallas import tpu as pltpu


# ----------------------------------------------------------------------------
# Packing / sizing helpers
# ----------------------------------------------------------------------------
def _choose_pack(c_in, hidden, c_out, weight_itemsize):
    """Row-packing factor so the packed output width reaches 128 lanes.

    Packing by `pack` turns the weights into block-diagonal (pack*C, pack*H)
    matrices; keep that bounded so resident weight VMEM stays small.
    """
    if c_out >= 128 or 128 % c_out != 0:
        return 1
    pack = 128 // c_out  # power of two
    budget = 2 * 1024 * 1024  # per packed weight matrix
    while pack > 1 and (
        pack * pack * max(c_in * hidden, hidden * c_out) * weight_itemsize > budget
    ):
        pack //= 2
    return pack


def _vmem_capacity_bytes():
    """Physical per-TensorCore VMEM; conservative (v7x) fallback if unknown."""
    try:
        info = pltpu.get_tpu_info()
        for attr in ("vmem_capacity_bytes", "vmem_bytes", "vmem_size_bytes"):
            v = getattr(info, attr, None)
            if v:
                return int(v)
    except Exception:
        pass
    return 64 * 1024 * 1024


def _round_down8(v):
    return max(8, (v // 8) * 8)


def _round_up8(v):
    return max(8, ((v + 7) // 8) * 8)


# ----------------------------------------------------------------------------
# Parameter preparation (hoisted out of the per-call path)
# ----------------------------------------------------------------------------
def prepare_inference_params(w1, b1, w2, b2, *, mxu_dtype=jnp.bfloat16):
    """Build the lane-packed (block-diagonal) weights ONCE.

    Returns a dict of arrays (a plain pytree) to pass to
    `inference_base_forward`.  MXU operands are stored in `mxu_dtype`
    (bf16 default: 2-4x MXU throughput vs f32 on v5e/v6e/v7x); biases are
    kept in f32 for the epilogue.  Use mxu_dtype=jnp.float32 to match the
    PyTorch module's f32 math exactly (at lower throughput).
    """
    w1 = jnp.asarray(w1)
    w2 = jnp.asarray(w2)
    c_in, hidden = w1.shape
    c_out = w2.shape[1]
    pack = _choose_pack(c_in, hidden, c_out, jnp.dtype(mxu_dtype).itemsize)

    w1m = w1.astype(mxu_dtype)
    w2m = w2.astype(mxu_dtype)
    eye = jnp.eye(pack, dtype=mxu_dtype)
    w1p = jnp.kron(eye, w1m)                               # (pack*C_in, pack*H)
    w2p = jnp.kron(eye, w2m)                               # (pack*H, pack*C_out)
    b1f = jnp.asarray(b1, jnp.float32).reshape(1, hidden)
    b2f = jnp.asarray(b2, jnp.float32).reshape(1, c_out)
    b1p = jnp.tile(b1f, (1, pack))                         # (1, pack*H)
    b2p = jnp.tile(b2f, (1, pack))                         # (1, pack*C_out)
    # TODO(synk): optional int8-weight path for v5e/v6e only (v7x MXU has no int).
    return dict(w1p=w1p, b1p=b1p, w2p=w2p, b2p=b2p,
                w1m=w1m, b1f=b1f, w2m=w2m, b2f=b2f)


# ----------------------------------------------------------------------------
# Kernel
# ----------------------------------------------------------------------------
def _mlp_kernel(x_ref, w1_ref, b1_ref, w2_ref, b2_ref, o_ref, *,
                chunk, num_chunks, rem):
    # x_ref : (TM_S, pack*C_in)       w1_ref: (pack*C_in, pack*H)   [mxu dtype]
    # b1_ref: (1, pack*H) f32         w2_ref: (pack*H, pack*C_out)  [mxu dtype]
    # b2_ref: (1, pack*C_out) f32     o_ref : (TM_S, pack*C_out)
    w1 = w1_ref[...]
    w2 = w2_ref[...]
    b1 = b1_ref[...]
    b2 = b2_ref[...]
    mxu_dtype = w1.dtype

    def body(r0, rows):
        # Explicit cast of the activation chunk so the MXU always takes the
        # fast (bf16 by default) path, regardless of the HBM activation dtype.
        x = x_ref[pl.ds(r0, rows), :].astype(mxu_dtype)
        h = jnp.dot(x, w1, preferred_element_type=jnp.float32)
        h = jnp.maximum(h + b1, 0.0)                        # f32 bias + ReLU (VPU)
        y = jnp.dot(h.astype(mxu_dtype), w2, preferred_element_type=jnp.float32)
        y = y + b2
        o_ref[pl.ds(r0, rows), :] = y.astype(o_ref.dtype)   # single final cast

    if num_chunks == 1 and rem == 0:
        body(0, chunk)
    else:
        # Chunk the row tile so the f32 hidden activation stays vreg-sized.
        # Partial unroll keeps LLO scheduling visibility without the bundle /
        # compile-time bloat (and vreg pressure) of fully unrolling 32+ chunks.
        unroll = num_chunks if num_chunks <= 8 else 4

        def loop_body(c, carry):
            body(pl.multiple_of(c * chunk, chunk), chunk)
            return carry

        jax.lax.fori_loop(0, num_chunks, loop_body, None, unroll=unroll)
        if rem:
            body(num_chunks * chunk, rem)    # static epilogue chunk (no OOB)


# ----------------------------------------------------------------------------
# Wrappers
# ----------------------------------------------------------------------------
def _packed_mlp_pallas(x2d, params, pack, tm_rows):
    """Run the lane-packed MLP kernel over x2d of shape (N, C_in), N % pack == 0."""
    n, c_in = x2d.shape
    hidden = params["w1m"].shape[1]
    c_out = params["w2m"].shape[1]
    pc_in, p_h, pc_out = pack * c_in, pack * hidden, pack * c_out

    n_s = n // pack
    x_s = x2d.reshape(n_s, pc_in)            # free row-major view

    # Generation-aware tile sizing: bigger blocks on v5e/v6e (128 MiB VMEM),
    # tighter on v7x (64 MiB physical per TensorCore).
    vmem_cap = _vmem_capacity_bytes()
    if vmem_cap >= 100 * 1024 * 1024:        # v5e / v6e
        block_budget = 32 * 1024 * 1024
        vmem_limit = 96 * 1024 * 1024
    else:                                     # v7x
        block_budget = 20 * 1024 * 1024
        vmem_limit = 48 * 1024 * 1024

    itemsize = jnp.dtype(x2d.dtype).itemsize
    weight_bytes = 2 * sum(
        int(params[k].size) * jnp.dtype(params[k].dtype).itemsize
        for k in ("w1p", "w2p", "b1p", "b2p"))
    avail = max(block_budget - weight_bytes, 2 * 1024 * 1024)
    row_bytes = (pc_in + pc_out) * itemsize
    max_tm_s = _round_down8(avail // (2 * row_bytes))

    tm_s = _round_down8(max(tm_rows, 8) // pack)
    tm_s = min(tm_s, max_tm_s)
    # Keep >=2 (>=4 when big) grid steps so ("parallel",) can shard the row
    # axis across both TensorCores on v7x (and balance the last block).
    if n_s >= 32:
        min_steps = 4 if n_s >= 512 else 2
        tm_s = min(tm_s, _round_up8(pl.cdiv(n_s, min_steps)))
    if n_s <= tm_s:
        tm_s = n_s                            # single full-extent block

    chunk = min(32, tm_s)                     # f32 hidden live set ~16 vregs
    num_chunks = tm_s // chunk
    rem = tm_s % chunk

    grid = (pl.cdiv(n_s, tm_s),)              # ragged last block handled by Pallas

    out = pl.pallas_call(
        functools.partial(_mlp_kernel, chunk=chunk, num_chunks=num_chunks, rem=rem),
        out_shape=jax.ShapeDtypeStruct((n_s, pc_out), x2d.dtype),
        grid_spec=pltpu.PrefetchScalarGridSpec(
            num_scalar_prefetch=0,
            grid=grid,
            in_specs=[
                # TODO(synk): add pipeline_mode=pl.Buffered(3) on activations if
                # a v7x profile shows exposed DMA at grid-step boundaries.
                pl.BlockSpec((tm_s, pc_in), lambda i: (i, 0)),    # activations
                pl.BlockSpec((pc_in, p_h), lambda i: (0, 0)),     # W1 (resident)
                pl.BlockSpec((1, p_h), lambda i: (0, 0)),         # b1 (resident)
                pl.BlockSpec((p_h, pc_out), lambda i: (0, 0)),    # W2 (resident)
                pl.BlockSpec((1, pc_out), lambda i: (0, 0)),      # b2 (resident)
            ],
            out_specs=pl.BlockSpec((tm_s, pc_out), lambda i: (i, 0)),
        ),
        compiler_params=pltpu.CompilerParams(
            dimension_semantics=("parallel",),
            vmem_limit_bytes=vmem_limit,
        ),
    )(x_s, params["w1p"], params["b1p"], params["w2p"], params["b2p"])

    return out.reshape(n, c_out)              # free row-major view


def _small_mlp(x2d, params, out_dtype):
    """Tiny unpacked fallback for <pack leftover rows (same numeric recipe)."""
    mxu_dtype = params["w1m"].dtype
    h = jnp.dot(x2d.astype(mxu_dtype), params["w1m"],
                preferred_element_type=jnp.float32)
    h = jnp.maximum(h + params["b1f"], 0.0)
    y = jnp.dot(h.astype(mxu_dtype), params["w2m"],
                preferred_element_type=jnp.float32)
    return (y + params["b2f"]).astype(out_dtype)


def inference_base_forward(inputs, params, *, tm_rows=8192):
    """InferenceBase.forward: shared MLP applied along the last axis of `inputs`.

    `params` comes from prepare_inference_params (packed weights built once and
    reused across calls).  tm_rows: target original rows per grid step.
    """
    lead_shape = inputs.shape[:-1]
    c_in = params["w1m"].shape[0]
    c_out = params["w2m"].shape[1]
    assert inputs.shape[-1] == c_in, (inputs.shape, c_in)
    pack = params["w1p"].shape[0] // c_in

    x = inputs.reshape(-1, c_in)
    n = x.shape[0]
    n_main = (n // pack) * pack               # bulk rows through the Pallas kernel

    pieces = []
    if n_main > 0:
        x_main = x if n_main == n else jax.lax.slice_in_dim(x, 0, n_main, axis=0)
        pieces.append(_packed_mlp_pallas(x_main, params, pack, tm_rows))
    if n_main < n:
        # <pack leftover rows: tiny unpacked matmul instead of padding/slicing
        # the whole activation tensor.
        x_rem = jax.lax.slice_in_dim(x, n_main, n, axis=0)
        pieces.append(_small_mlp(x_rem, params, inputs.dtype))
    out = pieces[0] if len(pieces) == 1 else jnp.concatenate(pieces, axis=0)
    return out.reshape(*lead_shape, c_out)


def init_params(key, input_dim, hidden_dim, output_dim, dtype=jnp.float32):
    """Deterministic init matching nn.Linear defaults (U[-1/sqrt(fan_in), ...])."""
    k1, k2, k3, k4 = jax.random.split(key, 4)
    bound1 = 1.0 / jnp.sqrt(input_dim)
    bound2 = 1.0 / jnp.sqrt(hidden_dim)
    w1 = jax.random.uniform(k1, (input_dim, hidden_dim), dtype,
                            minval=-bound1, maxval=bound1)
    b1 = jax.random.uniform(k2, (hidden_dim,), dtype,
                            minval=-bound1, maxval=bound1)
    w2 = jax.random.uniform(k3, (hidden_dim, output_dim), dtype,
                            minval=-bound2, maxval=bound2)
    b2 = jax.random.uniform(k4, (output_dim,), dtype,
                            minval=-bound2, maxval=bound2)
    return w1, b1, w2, b2


if __name__ == "__main__":
    input_dim, hidden_dim, output_dim = 32, 64, 16
    key = jax.random.PRNGKey(0)
    kx, kp, kx2 = jax.random.split(key, 3)

    w1, b1, w2, b2 = init_params(kp, input_dim, hidden_dim, output_dim)

    # Packed weights built ONCE (kron / tile / bf16 cast hoisted out of the
    # per-call path) and reused by every jitted forward call.
    params = prepare_inference_params(w1, b1, w2, b2)

    fwd = jax.jit(inference_base_forward)

    def ref_f32(x):
        f = x.reshape(-1, input_dim)
        f = jnp.maximum(f @ w1 + b1, 0.0) @ w2 + b2
        return f.reshape(*x.shape[:-1], output_dim)

    def ref_bf16(x):
        bf = jnp.bfloat16
        f = x.reshape(-1, input_dim)
        h = jnp.dot(f.astype(bf), w1.astype(bf), preferred_element_type=jnp.float32)
        h = jnp.maximum(h + b1, 0.0)
        y = jnp.dot(h.astype(bf), w2.astype(bf), preferred_element_type=jnp.float32)
        return (y + b2).astype(x.dtype).reshape(*x.shape[:-1], output_dim)

    # Small case matching the module's typical usage (batch, objects, channels).
    x1 = jax.random.normal(kx, (2, 8, input_dim), dtype=jnp.float32)
    out1 = jax.block_until_ready(fwd(x1, params))
    assert out1.shape == (2, 8, output_dim)
    assert jnp.allclose(out1, ref_bf16(x1), atol=2e-3, rtol=2e-2)
    assert jnp.allclose(out1, ref_f32(x1), atol=1e-1, rtol=1e-1)

    # Larger ragged case: multi-block grid, ragged last block, <pack remainder
    # path, inner chunk loop with remainder chunk.
    x2 = jax.random.normal(kx2, (3, 700, input_dim), dtype=jnp.float32)
    out2 = jax.block_until_ready(fwd(x2, params))
    assert out2.shape == (3, 700, output_dim)
    assert jnp.allclose(out2, ref_bf16(x2), atol=2e-3, rtol=2e-2)
    assert jnp.allclose(out2, ref_f32(x2), atol=1e-1, rtol=1e-1)

    print("KERNEL_OK")
</pallas_src>

<mosaic_0001>
module attributes {stable_mosaic.version = 11 : i64} {
  func.func @_mlp_kernel(%arg0: i32, %arg1: memref<2x256xf32, #tpu.memory_space<vmem>>, %arg2: memref<256x512xbf16, #tpu.memory_space<vmem>>, %arg3: memref<1x512xf32, #tpu.memory_space<vmem>>, %arg4: memref<512x128xbf16, #tpu.memory_space<vmem>>, %arg5: memref<1x128xf32, #tpu.memory_space<vmem>>, %arg6: memref<2x128xf32, #tpu.memory_space<vmem>>) attributes {dimension_semantics = [#tpu.dimension_semantics<parallel>], iteration_bounds = array<i64: 1>, scalar_prefetch = 0 : i64, scratch_operands = 0 : i64, tpu.core_type = #tpu.core_type<tc>, window_params = [{transform_indices = @transform_0, window_bounds = array<i64: 2, 256>}, {pipeline_mode = #tpu.pipeline_mode<synchronous>, transform_indices = @transform_1, window_bounds = array<i64: 256, 512>}, {pipeline_mode = #tpu.pipeline_mode<synchronous>, transform_indices = @transform_2, window_bounds = array<i64: 1, 512>}, {pipeline_mode = #tpu.pipeline_mode<synchronous>, transform_indices = @transform_3, window_bounds = array<i64: 512, 128>}, {pipeline_mode = #tpu.pipeline_mode<synchronous>, transform_indices = @transform_4, window_bounds = array<i64: 1, 128>}, {transform_indices = @transform_5, window_bounds = array<i64: 2, 128>}]} {
    %c0 = arith.constant 0 : index
    %c0_0 = arith.constant 0 : index
    %0 = vector.load %arg2[%c0, %c0_0] : memref<256x512xbf16, #tpu.memory_space<vmem>>, vector<256x512xbf16>
    %c0_1 = arith.constant 0 : index
    %c0_2 = arith.constant 0 : index
    %1 = vector.load %arg4[%c0_1, %c0_2] : memref<512x128xbf16, #tpu.memory_space<vmem>>, vector<512x128xbf16>
    %c0_3 = arith.constant 0 : index
    %c0_4 = arith.constant 0 : index
    %2 = vector.load %arg3[%c0_3, %c0_4] : memref<1x512xf32, #tpu.memory_space<vmem>>, vector<1x512xf32>
    %c0_5 = arith.constant 0 : index
    %c0_6 = arith.constant 0 : index
    %3 = vector.load %arg5[%c0_5, %c0_6] : memref<1x128xf32, #tpu.memory_space<vmem>>, vector<1x128xf32>
    %c0_7 = arith.constant 0 : index
    %c0_8 = arith.constant 0 : index
    %4 = vector.load %arg1[%c0_7, %c0_8] : memref<2x256xf32, #tpu.memory_space<vmem>>, vector<2x256xf32>
    %5 = arith.truncf %4 : vector<2x256xf32> to vector<2x256xbf16>
    %cst = arith.constant dense<0.000000e+00> : vector<2x512xf32>
    %6 = tpu.matmul %5, %0, %cst {dimension_numbers = #tpu.dot_dimension_numbers<[1], [0], [0], [1], [0, 0, 1, 1], [], []>} : vector<2x256xbf16>, vector<256x512xbf16>, vector<2x512xf32> -> vector<2x512xf32>
    %7 = vector.broadcast %2 : vector<1x512xf32> to vector<2x512xf32>
    %8 = arith.addf %6, %7 : vector<2x512xf32>
    %cst_9 = arith.constant 0.000000e+00 : f32
    %9 = vector.broadcast %cst_9 : f32 to vector<2x512xf32>
    %10 = arith.maximumf %8, %9 : vector<2x512xf32>
    %11 = arith.truncf %10 : vector<2x512xf32> to vector<2x512xbf16>
    %cst_10 = arith.constant dense<0.000000e+00> : vector<2x128xf32>
    %12 = tpu.matmul %11, %1, %cst_10 {dimension_numbers = #tpu.dot_dimension_numbers<[1], [0], [0], [1], [0, 0, 1, 1], [], []>} : vector<2x512xbf16>, vector<512x128xbf16>, vector<2x128xf32> -> vector<2x128xf32>
    %13 = vector.broadcast %3 : vector<1x128xf32> to vector<2x128xf32>
    %14 = arith.addf %12, %13 : vector<2x128xf32>
    %c0_11 = arith.constant 0 : index
    %c0_12 = arith.constant 0 : index
    %15 = vector.load %arg6[%c0_11, %c0_12] : memref<2x128xf32, #tpu.memory_space<vmem>>, vector<2x128xf32>
    tpu.vector_store %arg6[%c0_11, %c0_12], %14 {strides = array<i32>} : memref<2x128xf32, #tpu.memory_space<vmem>>, vector<2x128xf32>,
    return
  }
  func.func @transform_0(%arg0: i32) -> (i32, i32) {
    %c0_i32 = arith.constant 0 : i32
    %c0_i32_0 = arith.constant 0 : i32
    return %arg0, %c0_i32 : i32, i32
  }
  func.func @transform_1(%arg0: i32) -> (i32, i32) {
    %c0_i32 = arith.constant 0 : i32
    %c0_i32_0 = arith.constant 0 : i32
    %c0_i32_1 = arith.constant 0 : i32
    return %c0_i32, %c0_i32_0 : i32, i32
  }
  func.func @transform_2(%arg0: i32) -> (i32, i32) {
    %c0_i32 = arith.constant 0 : i32
    %c0_i32_0 = arith.constant 0 : i32
    %c0_i32_1 = arith.constant 0 : i32
    return %c0_i32, %c0_i32_0 : i32, i32
  }
  func.func @transform_3(%arg0: i32) -> (i32, i32) {
    %c0_i32 = arith.constant 0 : i32
    %c0_i32_0 = arith.constant 0 : i32
    %c0_i32_1 = arith.constant 0 : i32
    return %c0_i32, %c0_i32_0 : i32, i32
  }
  func.func @transform_4(%arg0: i32) -> (i32, i32) {
    %c0_i32 = arith.constant 0 : i32
    %c0_i32_0 = arith.constant 0 : i32
    %c0_i32_1 = arith.constant 0 : i32
    return %c0_i32, %c0_i32_0 : i32, i32
  }
  func.func @transform_5(%arg0: i32) -> (i32, i32) {
    %c0_i32 = arith.constant 0 : i32
    %c0_i32_0 = arith.constant 0 : i32
    return %arg0, %c0_i32 : i32, i32
  }
}

</mosaic_0001>

<bundles_post_ra>
// kernel: inference_base_forward.1
= control target key start
LH: loop header
LB: loop body
LE: loop exit
PB: predicated region body
PF: predicated region fallthrough
CT: control target
= control target key end

     0   :  { %10 = vsyncpa [#allocation3], 0  ;;  %s1305_s0 = inlined_call_operand.vmem [shape: f32[2,256], index: 0, kind: input, shape index: {}]   ;;  %s1306_s1 = inlined_call_operand.hbm [shape: bf16[256,512], index: 1, kind: input, shape index: {}]   ;;  %s1307_s2 = inlined_call_operand.vmem [shape: f32[1,512], index: 2, kind: input, shape index: {}]   ;;  %s1308_s3 = inlined_call_operand.hbm [shape: bf16[512,128], index: 3, kind: input, shape index: {}]   ;;  %s1309_s4 = inlined_call_operand.vmem [shape: f32[1,128], index: 4, kind: input, shape index: {}]   ;;  %s1310_s5 = inlined_call_operand.vmem [shape: f32[2,128], index: 5, kind: output, shape index: {}]  }
   0x1   :  { %11 = vsyncpa [#allocation5], 0  ;;  %s1233_s18 = smov [#allocation2]   ;;  %s1185_s22 = scalar_lea.hbm %s1306_s1, 8192 }
   0x2   :  { %s19_s19 = sshll.u32 %s1233_s18, 4  ;;  %p1186_p0 = scmp.ne.s32.totalorder %s1306_s1, %s1185_s22  ;;  %s20_s19 = int_to_ptr.vmem [resolvable:$true] %s19_s19 }
   0x3   :  { %p1189_p1 = scmp.lt.u32.totalorder %s1185_s22, %s1306_s1 }
   0x5   :  { %p1191_p2 = pnand %p1189_p1, %p1186_p0 }
   0x7   :  { %1194 = shalt.err (!%p1191_p2)
}
   0x8   :  { %s1195_s27 = scalar_lea.vmem %s20_s19, 8192  ;;  %p1200_p4 = scmp.lt.s32.totalorder %s20_s19, %s20_s19 }
   0x9   :  { %p1196_p3 = scmp.ne.s32.totalorder %s20_s19, %s1195_s27  ;;  %p1201_p5 = scmp.lt.s32.totalorder %s1195_s27, %s1195_s27 }
   0xb   :  { %p1202_p6 = por %p1201_p5, %p1200_p4 }
   0xd   :  { %p1203_p7 = pnand %p1202_p6, %p1196_p3 }
   0xf   :  { %1206 = shalt.err (!%p1203_p7)
}
  0x10   :  { %s1234_s28 = smov 256   ;;  %s1235_s29 = smov 16  }
  0x11   :  { %25 = dma.hbm_to_vmem [thread:$0]  %s1306_s1, 8192, %s20_s19, [#allocation3], %s1234_s28, %s1234_s28, %s1235_s29  }
  0x12   :  { %s1236_s7 = smov [#allocation4]   ;;  %s1207_s11 = scalar_lea.hbm %s1308_s3, 4096 }
  0x13   :  { %s33_s8 = sshll.u32 %s1236_s7, 4  ;;  %p1208_p8 = scmp.ne.s32.totalorder %s1308_s3, %s1207_s11  ;;  %s34_s8 = int_to_ptr.vmem [resolvable:$true] %s33_s8 }
  0x14   :  { %p1211_p9 = scmp.lt.u32.totalorder %s1207_s11, %s1308_s3 }
  0x16   :  { %p1213_p10 = pnand %p1211_p9, %p1208_p8 }
  0x18   :  { %1216 = shalt.err (!%p1213_p10)
}
  0x19   :  { %s1217_s16 = scalar_lea.vmem %s34_s8, 4096  ;;  %p1222_p12 = scmp.lt.s32.totalorder %s34_s8, %s34_s8 }
  0x1a   :  { %p1218_p11 = scmp.ne.s32.totalorder %s34_s8, %s1217_s16  ;;  %p1223_p13 = scmp.lt.s32.totalorder %s1217_s16, %s1217_s16 }
  0x1c   :  { %p1224_p0 = por %p1223_p13, %p1222_p12 }
  0x1e   :  { %p1225_p1 = pnand %p1224_p0, %p1218_p11 }
  0x20   :  { %1228 = shalt.err (!%p1225_p1)
}
  0x21   :  { %s1237_s1 = smov 64   ;;  %s1238_s17 = smov 4  }
  0x22   :  { %39 = dma.hbm_to_vmem [thread:$0]  %s1308_s3, 4096, %s34_s8, [#allocation5], %s1237_s1, %s1237_s1, %s1238_s17  }
  0x23   :  { %1229 = dma.done.wait [#allocation3], 8192  }
  0x24   :  { %1230 = vsyncadd [#allocation3], 4294959104 }
  0x25   :  { %1231 = dma.done.wait [#allocation5], 4096  }
  0x26   :  { %1232 = vsyncadd [#allocation5], 4294963200  ;;  %v1057_v0 = vld [vmem:[#allocation2 + $0x4] ss:$16 sps:$4 sm:$0xff]   ;;  %v1059_v1 = vld [vmem:[#allocation2 + $0xc] ss:$16 sps:$4 sm:$0xff]  }
  0x27   :  { %534 = vmatprep.subr.bf16.mxu0 %v1057_v0  ;;  %v1061_v2 = vld [vmem:[#allocation2] ss:$16 sps:$4 sm:$0xff]   ;;  %v1062_v3 = vld [vmem:[#allocation2 + $0x8] ss:$16 sps:$4 sm:$0xff]   ;;  %575 = vmatprep.subr.bf16.mxu1 %v1059_v1  ;;  %v1063_v4 = vld [vmem:[#allocation2 + $0x24] ss:$16 sps:$4 sm:$0xff]  }
  0x28   :  { %535 = vmatpush1.bf16.msra.mxu0 %v1061_v2  ;;  %576 = vmatpush1.bf16.msra.mxu1 %v1062_v3  ;;  %v1065_v5 = vld [vmem:[#allocation2 + $0x2c] ss:$16 sps:$4 sm:$0xff]   ;;  %v1067_v6 = vld [vmem:[#allocation2 + $0x20] ss:$16 sps:$4 sm:$0xff]   ;;  %v1068_v7 = vld [vmem:[#allocation2 + $0x28] ss:$16 sps:$4 sm:$0xff]  }
  0x29   :  { %536 = vmatprep.subr.bf16.mxu0 %v1063_v4  ;;  %577 = vmatprep.subr.bf16.mxu1 %v1065_v5  ;;  %v1069_v8 = vld [vmem:[#allocation2 + $0x44] ss:$16 sps:$4 sm:$0xff]   ;;  %v1071_v9 = vld [vmem:[#allocation2 + $0x4c] ss:$16 sps:$4 sm:$0xff]   ;;  %v1073_v10 = vld [vmem:[#allocation2 + $0x40] ss:$16 sps:$4 sm:$0xff]  }
  0x2a   :  { %v1074_v11 = vld [vmem:[#allocation2 + $0x48] ss:$16 sps:$4 sm:$0xff]   ;;  %v1075_v12 = vld [vmem:[#allocation2 + $0x64] ss:$16 sps:$4 sm:$0xff]   ;;  %v1077_v13 = vld [vmem:[#allocation2 + $0x6c] ss:$16 sps:$4 sm:$0xff]  }
  0x2b   :  { %v1079_v14 = vld [vmem:[#allocation2 + $0x60] ss:$16 sps:$4 sm:$0xff]   ;;  %v1080_v15 = vld [vmem:[#allocation2 + $0x68] ss:$16 sps:$4 sm:$0xff]   ;;  %v1081_v16 = vld [vmem:[#allocation2 + $0x84] ss:$16 sps:$4 sm:$0xff]  }
  0x2c   :  { %537 = vmatpush1.bf16.msra.mxu0 %v1067_v6  ;;  %578 = vmatpush1.bf16.msra.mxu1 %v1068_v7  ;;  %v1083_v17 = vld [vmem:[#allocation2 + $0x8c] ss:$16 sps:$4 sm:$0xff]   ;;  %v1085_v18 = vld [vmem:[#allocation2 + $0x80] ss:$16 sps:$4 sm:$0xff]   ;;  %v1086_v19 = vld [vmem:[#allocation2 + $0x88] ss:$16 sps:$4 sm:$0xff]  }
  0x2d   :  { %538 = vmatprep.subr.bf16.mxu0 %v1069_v8  ;;  %579 = vmatprep.subr.bf16.mxu1 %v1071_v9  ;;  %v1087_v20 = vld [vmem:[#allocation2 + $0xa4] ss:$16 sps:$4 sm:$0xff]   ;;  %v1089_v21 = vld [vmem:[#allocation2 + $0xac] ss:$16 sps:$4 sm:$0xff]   ;;  %v1091_v22 = vld [vmem:[#allocation2 + $0xa0] ss:$16 sps:$4 sm:$0xff]  }
  0x2e   :  { %v1092_v23 = vld [vmem:[#allocation2 + $0xa8] ss:$16 sps:$4 sm:$0xff]   ;;  %v1093_v24 = vld [vmem:[#allocation2 + $0xc4] ss:$16 sps:$4 sm:$0xff]   ;;  %v1095_v25 = vld [vmem:[#allocation2 + $0xcc] ss:$16 sps:$4 sm:$0xff]  }
  0x2f   :  { %v1097_v26 = vld [vmem:[#allocation2 + $0xc0] ss:$16 sps:$4 sm:$0xff]   ;;  %v1098_v27 = vld [vmem:[#allocation2 + $0xc8] ss:$16 sps:$4 sm:$0xff]   ;;  %v1099_v28 = vld [vmem:[#allocation2 + $0xe4] ss:$16 sps:$4 sm:$0xff]  }
  0x30   :  { %539 = vmatpush1.bf16.msra.mxu0 %v1073_v10  ;;  %580 = vmatpush1.bf16.msra.mxu1 %v1074_v11  ;;  %v1101_v29 = vld [vmem:[#allocation2 + $0xec] ss:$16 sps:$4 sm:$0xff]   ;;  %v1103_v30 = vld [vmem:[#allocation2 + $0xe0] ss:$16 sps:$4 sm:$0xff]   ;;  %v1104_v31 = vld [vmem:[#allocation2 + $0xe8] ss:$16 sps:$4 sm:$0xff]  }
  0x31   :  { %540 = vmatprep.subr.bf16.mxu0 %v1075_v12  ;;  %581 = vmatprep.subr.bf16.mxu1 %v1077_v13  ;;  %v1105_v32 = vld [vmem:[#allocation2 + $0x104] ss:$16 sps:$4 sm:$0xff]   ;;  %v1107_v33 = vld [vmem:[#allocation2 + $0x10c] ss:$16 sps:$4 sm:$0xff]   ;;  %v1109_v34 = vld [vmem:[#allocation2 + $0x100] ss:$16 sps:$4 sm:$0xff]  }
  0x32   :  { %v1110_v35 = vld [vmem:[#allocation2 + $0x108] ss:$16 sps:$4 sm:$0xff]   ;;  %v1111_v36 = vld [vmem:[#allocation2 + $0x124] ss:$16 sps:$4 sm:$0xff]   ;;  %v1113_v37 = vld [vmem:[#allocation2 + $0x12c] ss:$16 sps:$4 sm:$0xff]  }
  0x33   :  { %v1115_v38 = vld [vmem:[#allocation2 + $0x120] ss:$16 sps:$4 sm:$0xff]   ;;  %v1116_v39 = vld [vmem:[#allocation2 + $0x128] ss:$16 sps:$4 sm:$0xff]   ;;  %v1117_v40 = vld [vmem:[#allocation2 + $0x144] ss:$16 sps:$4 sm:$0xff]  }
  0x34   :  { %541 = vmatpush1.bf16.msra.mxu0 %v1079_v14  ;;  %582 = vmatpush1.bf16.msra.mxu1 %v1080_v15  ;;  %v1119_v41 = vld [vmem:[#allocation2 + $0x14c] ss:$16 sps:$4 sm:$0xff]   ;;  %v1121_v42 = vld [vmem:[#allocation2 + $0x140] ss:$16 sps:$4 sm:$0xff]   ;;  %v1122_v43 = vld [vmem:[#allocation2 + $0x148] ss:$16 sps:$4 sm:$0xff]  }
  0x35   :  { %542 = vmatprep.subr.bf16.mxu0 %v1081_v16  ;;  %583 = vmatprep.subr.bf16.mxu1 %v1083_v17  ;;  %v1123_v44 = vld [vmem:[#allocation2 + $0x164] ss:$16 sps:$4 sm:$0xff]   ;;  %v1125_v45 = vld [vmem:[#allocation2 + $0x16c] ss:$16 sps:$4 sm:$0xff]   ;;  %v1127_v46 = vld [vmem:[#allocation2 + $0x160] ss:$16 sps:$4 sm:$0xff]  }
  0x36   :  { %v1128_v47 = vld [vmem:[#allocation2 + $0x168] ss:$16 sps:$4 sm:$0xff]   ;;  %v909_v48 = vld.sshfl [vmem:[%s1305_s0] sm:$0x33 pattern:$0x76325410] }
  0x37   :  { %v1129_v49 = vld [vmem:[#allocation2 + $0x184] ss:$16 sps:$4 sm:$0xff]   ;;  %v188_v50 = vcombine.high %v909_v48, %v909_v48  ;;  %v1131_v51 = vld [vmem:[#allocation2 + $0x18c] ss:$16 sps:$4 sm:$0xff]   ;;  %v1133_v52 = vld [vmem:[#allocation2 + $0x180] ss:$16 sps:$4 sm:$0xff]   ;;  %v191_v6 = vpack.c.bf16 %v909_v48, %v909_v48 }
  0x38   :  { %543 = vmatpush1.bf16.msra.mxu0 %v1085_v18  ;;  %584 = vmatpush1.bf16.msra.mxu1 %v1086_v19  ;;  %v1134_v54 = vld [vmem:[#allocation2 + $0x188] ss:$16 sps:$4 sm:$0xff]   ;;  %v1135_v55 = vld [vmem:[#allocation2 + $0x1a4] ss:$16 sps:$4 sm:$0xff]   ;;  %v1137_v56 = vld [vmem:[#allocation2 + $0x1ac] ss:$16 sps:$4 sm:$0xff]  }
  0x39   :  { %544 = vmatprep.subr.bf16.mxu0 %v1087_v20  ;;  %585 = vmatprep.subr.bf16.mxu1 %v1089_v21  ;;  %v192_v53 = vpack.c.bf16 %v188_v50, %v188_v50  ;;  %v1139_v57 = vld [vmem:[#allocation2 + $0x1a0] ss:$16 sps:$4 sm:$0xff]   ;;  %v1140_v58 = vld [vmem:[#allocation2 + $0x1a8] ss:$16 sps:$4 sm:$0xff]   ;;  %v1141_v59 = vld [vmem:[#allocation2 + $0x1c4] ss:$16 sps:$4 sm:$0xff]  }
  0x3a   :  { %v1143_v60 = vld [vmem:[#allocation2 + $0x1cc] ss:$16 sps:$4 sm:$0xff]   ;;  %v1145_v61 = vld [vmem:[#allocation2 + $0x1c0] ss:$16 sps:$4 sm:$0xff]   ;;  %v1146_v62 = vld [vmem:[#allocation2 + $0x1c8] ss:$16 sps:$4 sm:$0xff]  }
  0x3b   :  { %566 = vmatprep.mubr.bf16.mxu0 %v192_v53  ;;  %607 = vmatprep.mubr.bf16.mxu1 %v192_v53  ;;  %v1147_v63 = vld [vmem:[#allocation2 + $0x1e4] ss:$16 sps:$4 sm:$0xff]   ;;  %v1149_v0 = vld [vmem:[#allocation2 + $0x1ec] ss:$16 sps:$4 sm:$0xff]   ;;  %v1151_v1 = vld [vmem:[#allocation2 + $0x1e0] ss:$16 sps:$4 sm:$0xff]  }
  0x3c   :  { %545 = vmatpush1.bf16.msra.mxu0 %v1091_v22  ;;  %586 = vmatpush1.bf16.msra.mxu1 %v1092_v23  ;;  %v1152_v2 = vld [vmem:[#allocation2 + $0x1e8] ss:$16 sps:$4 sm:$0xff]   ;;  %v1153_v3 = vld [vmem:[#allocation4 + $0x40] sm:$0xff]   ;;  %v1161_v12 = vld [vmem:[#allocation4 + $0x50] sm:$0xff]  }
  0x3d   :  { %546 = vmatprep.subr.bf16.mxu0 %v1093_v24  ;;  %587 = vmatprep.subr.bf16.mxu1 %v1095_v25  ;;  %v1154_v4 = vld [vmem:[#allocation4 + $0xc0] sm:$0xff]   ;;  %v1157_v8 = vld [vmem:[#allocation4 + $0x48] sm:$0xff]   ;;  %v1162_v13 = vld [vmem:[#allocation4 + $0xd0] sm:$0xff]  }
  0x3e   :  { %v1155_v5 = vld [vmem:[#allocation4] sm:$0xff]   ;;  %v1158_v9 = vld [vmem:[#allocation4 + $0xc8] sm:$0xff]   ;;  %v1163_v14 = vld [vmem:[#allocation4 + $0x10] sm:$0xff]  }
  0x3f   :  { %v1156_v7 = vld [vmem:[#allocation4 + $0x80] sm:$0xff]   ;;  %v1159_v10 = vld [vmem:[#allocation4 + $0x8] sm:$0xff]   ;;  %v1164_v15 = vld [vmem:[#allocation4 + $0x90] sm:$0xff]  }
  0x40   :  { %547 = vmatpush1.bf16.msra.mxu0 %v1097_v26  ;;  %588 = vmatpush1.bf16.msra.mxu1 %v1098_v27  ;;  %v1160_v11 = vld [vmem:[#allocation4 + $0x88] sm:$0xff]   ;;  %v1165_v16 = vld [vmem:[#allocation4 + $0x58] sm:$0xff]   ;;  %v1169_v20 = vld [vmem:[#allocation4 + $0x60] sm:$0xff]  }
  0x41   :  { %548 = vmatprep.subr.bf16.mxu0 %v1099_v28  ;;  %589 = vmatprep.subr.bf16.mxu1 %v1101_v29  ;;  %v1166_v17 = vld [vmem:[#allocation4 + $0xd8] sm:$0xff]   ;;  %v1170_v21 = vld [vmem:[#allocation4 + $0xe0] sm:$0xff]   ;;  %v1173_v24 = vld [vmem:[#allocation4 + $0x68] sm:$0xff]  }
  0x42   :  { %v1167_v18 = vld [vmem:[#allocation4 + $0x18] sm:$0xff]   ;;  %v1171_v22 = vld [vmem:[#allocation4 + $0x20] sm:$0xff]   ;;  %v1174_v25 = vld [vmem:[#allocation4 + $0xe8] sm:$0xff]  }
  0x43   :  { %v1168_v19 = vld [vmem:[#allocation4 + $0x98] sm:$0xff]   ;;  %v1172_v23 = vld [vmem:[#allocation4 + $0xa0] sm:$0xff]   ;;  %v1175_v26 = vld [vmem:[#allocation4 + $0x28] sm:$0xff]  }
  0x44   :  { %549 = vmatpush1.bf16.msra.mxu0 %v1103_v30  ;;  %590 = vmatpush1.bf16.msra.mxu1 %v1104_v31  ;;  %v1176_v27 = vld [vmem:[#allocation4 + $0xa8] sm:$0xff]   ;;  %v1177_v28 = vld [vmem:[#allocation4 + $0x70] sm:$0xff]  }
  0x45   :  { %550 = vmatprep.subr.bf16.mxu0 %v1105_v32  ;;  %591 = vmatprep.subr.bf16.mxu1 %v1107_v33  ;;  %v1178_v29 = vld [vmem:[#allocation4 + $0xf0] sm:$0xff]   ;;  %v1181_v32 = vld [vmem:[#allocation4 + $0x78] sm:$0xff]  }
  0x46   :  { %v1179_v30 = vld [vmem:[#allocation4 + $0x30] sm:$0xff]   ;;  %v1182_v33 = vld [vmem:[#allocation4 + $0xf8] sm:$0xff]  }
  0x47   :  { %v1180_v31 = vld [vmem:[#allocation4 + $0xb0] sm:$0xff]  }
  0x48   :  { %551 = vmatpush1.bf16.msra.mxu0 %v1109_v34  ;;  %592 = vmatpush1.bf16.msra.mxu1 %v1110_v35  ;;  %v1183_v34 = vld [vmem:[#allocation4 + $0x38] sm:$0xff]  }
  0x49   :  { %552 = vmatprep.subr.bf16.mxu0 %v1111_v36  ;;  %593 = vmatprep.subr.bf16.mxu1 %v1113_v37  ;;  %v1184_v35 = vld [vmem:[#allocation4 + $0xb8] sm:$0xff]   ;;  %v194_v36 = vlaneseq }
  0x4b   :  { %v195_v37 = vshrl.u32 %v194_v36, 7 }
  0x4c   :  { %553 = vmatpush1.bf16.msra.mxu0 %v1115_v38  ;;  %594 = vmatpush1.bf16.msra.mxu1 %v1116_v39 }
  0x4d   :  { %554 = vmatprep.subr.bf16.mxu0 %v1117_v40  ;;  %595 = vmatprep.subr.bf16.mxu1 %v1119_v41  ;;  %v196_v38 = vsub.s32 0, %v195_v37  ;;  %v204_v39 = vsub.s32 2, %v195_v37  ;;  %v177_v40 = vld [vmem:[%s1307_s2] sm:$0xf]  ;;  %v200_v41 = vsub.s32 1, %v195_v37 }
  0x50   :  { %555 = vmatpush1.bf16.msra.mxu0 %v1121_v42  ;;  %596 = vmatpush1.bf16.msra.mxu1 %v1122_v43  ;;  %v208_v42 = vsub.s32 3, %v195_v37  ;;  %v197_v43 = vrot.slane %v177_v40, %v196_v38 }
  0x51   :  { %556 = vmatprep.subr.bf16.mxu0 %v1123_v44  ;;  %597 = vmatprep.subr.bf16.mxu1 %v1125_v45  ;;  %v205_v44 = vrot.slane %v177_v40, %v204_v39  ;;  %v201_v45 = vrot.slane %v177_v40, %v200_v41 }
  0x54   :  { %557 = vmatpush1.bf16.msra.mxu0 %v1127_v46  ;;  %598 = vmatpush1.bf16.msra.mxu1 %v1128_v47  ;;  %v209_v46 = vrot.slane %v177_v40, %v208_v42 }
  0x55   :  { %558 = vmatprep.subr.bf16.mxu0 %v1129_v49  ;;  %599 = vmatprep.subr.bf16.mxu1 %v1131_v51 }
  0x58   :  { %559 = vmatpush1.bf16.msra.mxu0 %v1133_v52  ;;  %600 = vmatpush1.bf16.msra.mxu1 %v1134_v54 }
  0x59   :  { %560 = vmatprep.subr.bf16.mxu0 %v1135_v55  ;;  %601 = vmatprep.subr.bf16.mxu1 %v1137_v56 }
  0x5c   :  { %561 = vmatpush1.bf16.msra.mxu0 %v1139_v57  ;;  %602 = vmatpush1.bf16.msra.mxu1 %v1140_v58 }
  0x5d   :  { %562 = vmatprep.subr.bf16.mxu0 %v1141_v59  ;;  %603 = vmatprep.subr.bf16.mxu1 %v1143_v60 }
  0x60   :  { %563 = vmatpush1.bf16.msra.mxu0 %v1145_v61  ;;  %604 = vmatpush1.bf16.msra.mxu1 %v1146_v62 }
  0x61   :  { %564 = vmatprep.subr.bf16.mxu0 %v1147_v63  ;;  %605 = vmatprep.subr.bf16.mxu1 %v1149_v0 }
  0x64   :  { %565 = vmatpush1.bf16.msra.mxu0 %v1151_v1  ;;  %606 = vmatpush1.bf16.msra.mxu1 %v1152_v2 }
  0x65   :  { %1007 = vmatprep.subr.bf16.mxu0 %v1153_v3  ;;  %1029 = vmatprep.subr.bf16.mxu1 %v1154_v4 }
  0x67   :  { %567 = vmatmul.mubr.bf16.vlgmr.msra.gmra.mrb[0].mxu0 %v191_v6  ;;  %608 = vmatmul.mubr.bf16.vlgmr.msra.gmra.mrb[0].mxu1 %v191_v6 }
  0x68   :  { %1008 = vmatpush3.bf16.msra.mxu0 %v1155_v5  ;;  %1030 = vmatpush3.bf16.msra.mxu1 %v1156_v7  ;;  %v974_v5 = vld [vmem:[%s1309_s4] ss:$0 sm:$0xff] }
  0x69   :  { %1009 = vmatprep.subr.bf16.mxu0 %v1157_v8  ;;  %1031 = vmatprep.subr.bf16.mxu1 %v1158_v9 }
  0x6c   :  { %1010 = vmatpush3.bf16.msra.mxu0 %v1159_v10  ;;  %1032 = vmatpush3.bf16.msra.mxu1 %v1160_v11 }
  0x6d   :  { %1011 = vmatprep.subr.bf16.mxu0 %v1161_v12  ;;  %1033 = vmatprep.subr.bf16.mxu1 %v1162_v13 }
  0x70   :  { %1012 = vmatpush3.bf16.msra.mxu0 %v1163_v14  ;;  %1034 = vmatpush3.bf16.msra.mxu1 %v1164_v15 }
  0x71   :  { %1013 = vmatprep.subr.bf16.mxu0 %v1165_v16  ;;  %1035 = vmatprep.subr.bf16.mxu1 %v1166_v17 }
  0x74   :  { %1014 = vmatpush3.bf16.msra.mxu0 %v1167_v18  ;;  %1036 = vmatpush3.bf16.msra.mxu1 %v1168_v19 }
  0x75   :  { %1015 = vmatprep.subr.bf16.mxu0 %v1169_v20  ;;  %1037 = vmatprep.subr.bf16.mxu1 %v1170_v21 }
  0x78   :  { %1016 = vmatpush3.bf16.msra.mxu0 %v1171_v22  ;;  %1038 = vmatpush3.bf16.msra.mxu1 %v1172_v23 }
  0x79   :  { %1017 = vmatprep.subr.bf16.mxu0 %v1173_v24  ;;  %1039 = vmatprep.subr.bf16.mxu1 %v1174_v25 }
  0x7c   :  { %1018 = vmatpush3.bf16.msra.mxu0 %v1175_v26  ;;  %1040 = vmatpush3.bf16.msra.mxu1 %v1176_v27 }
  0x7d   :  { %1019 = vmatprep.subr.bf16.mxu0 %v1177_v28  ;;  %1041 = vmatprep.subr.bf16.mxu1 %v1178_v29 }
  0x80   :  { %1020 = vmatpush3.bf16.msra.mxu0 %v1179_v30  ;;  %1042 = vmatpush3.bf16.msra.mxu1 %v1180_v31 }
  0x81   :  { %1021 = vmatprep.subr.bf16.mxu0 %v1181_v32  ;;  %1043 = vmatprep.subr.bf16.mxu1 %v1182_v33 }
  0x84   :  { %1022 = vmatpush3.bf16.msra.mxu0 %v1183_v34  ;;  %1044 = vmatpush3.bf16.msra.mxu1 %v1184_v35 }
 0x13a   :  { %v568_v47 = vpop.f32.mrb[0].mxu0  ;;  %v609_v48 = vpop.f32.mrb[0].mxu1 }
 0x13b   :  { %v569_v49 = vadd.f32 %v568_v47, %v197_v43  ;;  %v610_v50 = vadd.f32 %v609_v48, %v205_v44  ;;  %v570_v51 = vpop.f32.mrb[1].mxu0  ;;  %v611_v52 = vpop.f32.mrb[1].mxu1 }
 0x13c   :  { %v571_v53 = vadd.f32 %v570_v51, %v201_v45  ;;  %v612_v54 = vadd.f32 %v611_v52, %v209_v46  ;;  %v572_v55 = vpop.f32.mrb[2].mxu0  ;;  %v613_v56 = vpop.f32.mrb[2].mxu1 }
 0x13d   :  { %v616_v57 = vmax.f32 %v569_v49, 0.0  ;;  %v618_v58 = vmax.f32 %v610_v50, 0.0  ;;  %v573_v59 = vpop.f32.mrb[3].mxu0  ;;  %v614_v60 = vpop.f32.mrb[3].mxu1 }
 0x13e   :  { %v617_v61 = vmax.f32 %v571_v53, 0.0  ;;  %v619_v62 = vmax.f32 %v612_v54, 0.0 }
 0x13f   :  { %v622_v63 = vpack.c.bf16 %v618_v58, %v618_v58  ;;  %v620_v2 = vpack.c.bf16 %v616_v57, %v616_v57 }
 0x140   :  { %v621_v0 = vpack.c.bf16 %v617_v61, %v617_v61  ;;  %v623_v1 = vpack.c.bf16 %v619_v62, %v619_v62 }
 0x142   :  { %854 = vmatprep.mubr.bf16.mxu0 %v621_v0  ;;  %894 = vmatprep.mubr.bf16.mxu1 %v623_v1 }
 0x143   :  { %855 = vmatmul.mubr.bf16.vlgmr.msra.gmra.mrb[4].mxu0 %v620_v2  ;;  %895 = vmatmul.mubr.bf16.vlgmr.msra.gmra.mrb[4].mxu1 %v622_v63 }
 0x216   :  { %v1023_v3 = vpop.f32.mrb[4].mxu0  ;;  %v1045_v4 = vpop.f32.mrb[4].mxu1 }
 0x217   :  { %v1024_v6 = vpop.f32.mrb[5].mxu0  ;;  %v1046_v7 = vpop.f32.mrb[5].mxu1 }
 0x218   :  { %v1025_v8 = vadd.f32 %v1024_v6, %v1023_v3  ;;  %v1047_v9 = vadd.f32 %v1046_v7, %v1045_v4  ;;  %v1026_v10 = vpop.f32.mrb[6].mxu0  ;;  %v1048_v11 = vpop.f32.mrb[6].mxu1 }
 0x219   :  { %v1027_v12 = vpop.f32.mrb[7].mxu0  ;;  %v1049_v13 = vpop.f32.mrb[7].mxu1 }
 0x21a   :  { %v857_v14 = vadd.f32 %v1025_v8, %v974_v5 }
 0x21c   :  { %v897_v15 = vadd.f32 %v1047_v9, %v857_v14 }
 0x21e   :  { %902 = vst [vmem:[%s1310_s5] sm:$0x3] %v897_v15 }
 0x21f   :  { %907 = vsyncpa [#allocation3], 1 }
 0x220   :  { %908 = vsyncpa [#allocation5], 1 }

</bundles_post_ra>
